<compile_context>
chip_gen: v5e
topology: v5e:2x2
jax: 0.10.0
libtpu: 0.0.40
codegen_flags: <defaults>
</compile_context>

<pallas_src>
import numpy as np
import jax
import jax.numpy as jnp
from jax import lax
from jax.experimental import pallas as pl
from jax.experimental.pallas import tpu as pltpu


def sym_adj(adj):
    """Dense numpy equivalent of the scipy-based sym_adj in util.py."""
    adj = np.asarray(adj, dtype=np.float64)
    rowsum = adj.sum(1)
    with np.errstate(divide="ignore"):
        d_inv_sqrt = np.power(rowsum, -0.5).flatten()
    d_inv_sqrt[np.isinf(d_inv_sqrt)] = 0.0
    d = np.diag(d_inv_sqrt)
    return adj.dot(d).T.dot(d).astype(np.float32)


def build_neg_mask_np(dtw_graph, geo_graph, num_nodes):
    """Host-side: (sym_adj(adj_m) == 0) | eye(N)  as a float32 (N, N) mask."""
    adj_m = dtw_graph + geo_graph if geo_graph is not None else dtw_graph
    adj_m_norm = sym_adj(adj_m)
    mask = (adj_m_norm == 0) | np.eye(num_nodes, dtype=bool)
    return mask.astype(np.float32)


def build_pair_weights(neg_mask_np, num_time):
    """Host-side (T*N, T*N) pair weights.

    W[(t,n),(s,m)] = [s==t]*neg_mask[n,m] + [m==n]
    so that  sum_c exp(S)[r,c] * W[r,c] = spatial_neg[t,n] + tempo_neg[n,t].
    """
    n = neg_mask_np.shape[0]
    w = np.kron(np.eye(num_time, dtype=np.float32), neg_mask_np)
    w += np.tile(np.eye(n, dtype=np.float32), (num_time, num_time))
    return jnp.asarray(w)


def _make_node_loss_kernel(TN, inv_temp):
    mean_scale = 1.0 / float(TN)

    def kernel(a_ref, b_ref, w_ref, out_ref):
        # Anchors and augmented reps, flattened to (T*N, D).
        a = a_ref[...].astype(jnp.float32)
        b = b_ref[...].astype(jnp.float32)

        # L2-normalize rows (rsqrt, no divide); fold 1/temperature into the anchors.
        a_n = a * (lax.rsqrt(jnp.sum(a * a, axis=-1, keepdims=True)) * inv_temp)
        b_n = b * lax.rsqrt(jnp.sum(b * b, axis=-1, keepdims=True))

        # Positives in f32 directly from the normalized rows (no exp/log round trip).
        pos = jnp.sum(a_n * b_n, axis=-1, keepdims=True)              # (TN, 1)

        # One-time transpose of the RHS, then a single full-width MXU matmul in bf16.
        b_t = jnp.transpose(b_n).astype(jnp.bfloat16)                 # (D, TN)
        s = lax.dot_general(
            a_n.astype(jnp.bfloat16), b_t,
            dimension_numbers=(((1,), (0,)), ((), ())),
            preferred_element_type=jnp.float32)                       # (TN, TN)

        e = jnp.exp(s)                                                # EUP, f32
        # spatial_neg + tempo_neg via one masked lane reduce; subtract pos once.
        denom = jnp.sum(e * w_ref[...], axis=-1, keepdims=True) - jnp.exp(pos)

        # -log(exp(pos)/denom) == log(denom) - pos
        out_ref[0, 0] = jnp.sum(jnp.log(denom) - pos) * mean_scale

    return kernel


def node_loss_con(rep_node, rep_node_aug, pair_weights, temperature=0.5):
    """Pallas implementation of NodeLoss_Con.forward. Returns a scalar."""
    T, N, D = rep_node.shape
    TN = T * N
    rep2 = rep_node.reshape(TN, D)
    aug2 = rep_node_aug.reshape(TN, D)

    kernel = _make_node_loss_kernel(TN, 1.0 / float(temperature))

    # Explicit scoped-VMEM budget: inputs (double-buffered), weight matrix, and
    # headroom for the (TN, TN) similarity / exp intermediates. Capped for v7x.
    work_bytes = (2 * TN * D * 4) * 2 + (TN * TN * 4) * 2 + 6 * TN * TN * 4
    vmem_limit = int(min(max(work_bytes * 5 // 4, 8 * 1024 * 1024),
                         56 * 1024 * 1024))

    out = pl.pallas_call(
        kernel,
        out_shape=jax.ShapeDtypeStruct((1, 1), jnp.float32),
        grid_spec=pltpu.PrefetchScalarGridSpec(
            num_scalar_prefetch=0,
            grid=(1,),                                   # single step: no pipeline overhead
            in_specs=[
                pl.BlockSpec((TN, D), lambda i: (0, 0)),     # anchors (flattened)
                pl.BlockSpec((TN, D), lambda i: (0, 0)),     # augmented (flattened)
                pl.BlockSpec((TN, TN), lambda i: (0, 0)),    # static pair weights
            ],
            out_specs=pl.BlockSpec(memory_space=pltpu.SMEM),
        ),
        compiler_params=pltpu.CompilerParams(
            dimension_semantics=("arbitrary",),
            vmem_limit_bytes=vmem_limit,
        ),
    )(rep2, aug2, pair_weights)
    return out[0, 0]


def node_loss_con_ref(rep_node, rep_node_aug, neg_mask, temperature=0.5):
    """Pure-JAX mirror of the PyTorch forward (given the precomputed (N,N) mask)."""
    rep = rep_node.astype(jnp.float32)
    aug = rep_node_aug.astype(jnp.float32)
    T, N, D = rep.shape

    tempo_rep = jnp.transpose(rep, (1, 0, 2))
    tempo_aug = jnp.transpose(aug, (1, 0, 2))
    tempo_norm = jnp.linalg.norm(tempo_rep, axis=2)[..., None]
    tempo_norm_aug = jnp.linalg.norm(tempo_aug, axis=2)[..., None]
    tempo_matrix = jnp.matmul(tempo_rep, jnp.transpose(tempo_aug, (0, 2, 1))) / \
        jnp.matmul(tempo_norm, jnp.transpose(tempo_norm_aug, (0, 2, 1)))
    tempo_matrix = jnp.exp(tempo_matrix / temperature)
    tempo_neg = jnp.sum(tempo_matrix, axis=2)                       # (N, T)

    spatial_norm = jnp.linalg.norm(rep, axis=2)[..., None]
    spatial_norm_aug = jnp.linalg.norm(aug, axis=2)[..., None]
    spatial_matrix = jnp.matmul(rep, jnp.transpose(aug, (0, 2, 1))) / \
        jnp.matmul(spatial_norm, jnp.transpose(spatial_norm_aug, (0, 2, 1)))
    spatial_matrix = jnp.exp(spatial_matrix / temperature)

    diag = jnp.eye(N, dtype=jnp.float32)
    pos_sum = jnp.sum(spatial_matrix * diag, axis=2)                # (T, N)
    spatial_neg = jnp.sum(spatial_matrix * neg_mask, axis=2)        # (T, N)

    ratio = pos_sum / (spatial_neg + tempo_neg.T - pos_sum)
    return jnp.mean(-jnp.log(ratio))


if __name__ == "__main__":
    key = jax.random.PRNGKey(0)
    k1, k2 = jax.random.split(key)

    # Small shapes consistent with the module: (time, num_nodes, hidden).
    T, N, D = 8, 16, 32
    temperature = 0.5

    rep_node = jax.random.normal(k1, (T, N, D), dtype=jnp.float32)
    rep_node_aug = jax.random.normal(k2, (T, N, D), dtype=jnp.float32)

    # Deterministic banded graphs standing in for dtw_graph / geo_graph.
    idx = np.arange(N)
    dtw_graph = (np.abs(idx[:, None] - idx[None, :]) <= 2).astype(np.float32)
    geo_graph = (np.abs(idx[:, None] - idx[None, :]) <= 1).astype(np.float32)

    neg_mask_np = build_neg_mask_np(dtw_graph, geo_graph, N)
    pair_weights = build_pair_weights(neg_mask_np, T)     # (T*N, T*N)
    neg_mask = jnp.asarray(neg_mask_np)                   # (N, N) for the reference

    loss = node_loss_con(rep_node, rep_node_aug, pair_weights, temperature)
    loss = jax.block_until_ready(loss)

    ref = jax.block_until_ready(
        node_loss_con_ref(rep_node, rep_node_aug, neg_mask, temperature))

    # bf16 MXU operands (f32 norms/exp/log/accumulation) -> allow a slightly
    # looser tolerance than pure f32.
    assert jnp.allclose(loss, ref, atol=5e-3, rtol=5e-3), (loss, ref)

    print("KERNEL_OK")
</pallas_src>

<mosaic_0001>
module attributes {stable_mosaic.version = 11 : i64} {
  func.func @kernel(%arg0: i32, %arg1: memref<128x32xf32, #tpu.memory_space<vmem>>, %arg2: memref<128x32xf32, #tpu.memory_space<vmem>>, %arg3: memref<128x128xf32, #tpu.memory_space<vmem>>, %arg4: memref<1x1xf32, #tpu.memory_space<smem>>) attributes {dimension_semantics = [#tpu.dimension_semantics<arbitrary>], iteration_bounds = array<i64: 1>, scalar_prefetch = 0 : i64, scratch_operands = 0 : i64, tpu.core_type = #tpu.core_type<tc>, window_params = [{pipeline_mode = #tpu.pipeline_mode<synchronous>, transform_indices = @transform_0, window_bounds = array<i64: 128, 32>}, {pipeline_mode = #tpu.pipeline_mode<synchronous>, transform_indices = @transform_1, window_bounds = array<i64: 128, 32>}, {pipeline_mode = #tpu.pipeline_mode<synchronous>, transform_indices = @transform_2, window_bounds = array<i64: 128, 128>}, {transform_indices = @transform_3, window_bounds = array<i64: 1, 1>}]} {
    %c0 = arith.constant 0 : index
    %c0_0 = arith.constant 0 : index
    %0 = vector.load %arg1[%c0, %c0_0] : memref<128x32xf32, #tpu.memory_space<vmem>>, vector<128x32xf32>
    %c0_1 = arith.constant 0 : index
    %c0_2 = arith.constant 0 : index
    %1 = vector.load %arg2[%c0_1, %c0_2] : memref<128x32xf32, #tpu.memory_space<vmem>>, vector<128x32xf32>
    %2 = arith.mulf %0, %0 : vector<128x32xf32>
    %cst = arith.constant dense<0.000000e+00> : vector<128xf32>
    %3 = vector.multi_reduction <add>, %2, %cst [1] : vector<128x32xf32> to vector<128xf32>
    %4 = vector.shape_cast %3 : vector<128xf32> to vector<128x1xf32>
    %5 = math.rsqrt %4 : vector<128x1xf32>
    %cst_3 = arith.constant 2.000000e+00 : f32
    %6 = vector.broadcast %cst_3 : f32 to vector<128x1xf32>
    %7 = arith.mulf %5, %6 : vector<128x1xf32>
    %8 = vector.broadcast %7 : vector<128x1xf32> to vector<128x32xf32>
    %9 = arith.mulf %0, %8 : vector<128x32xf32>
    %10 = arith.mulf %1, %1 : vector<128x32xf32>
    %cst_4 = arith.constant dense<0.000000e+00> : vector<128xf32>
    %11 = vector.multi_reduction <add>, %10, %cst_4 [1] : vector<128x32xf32> to vector<128xf32>
    %12 = vector.shape_cast %11 : vector<128xf32> to vector<128x1xf32>
    %13 = math.rsqrt %12 : vector<128x1xf32>
    %14 = vector.broadcast %13 : vector<128x1xf32> to vector<128x32xf32>
    %15 = arith.mulf %1, %14 : vector<128x32xf32>
    %16 = arith.mulf %9, %15 : vector<128x32xf32>
    %cst_5 = arith.constant dense<0.000000e+00> : vector<128xf32>
    %17 = vector.multi_reduction <add>, %16, %cst_5 [1] : vector<128x32xf32> to vector<128xf32>
    %18 = vector.shape_cast %17 : vector<128xf32> to vector<128x1xf32>
    %19 = tpu.transpose %15, [1, 0] : vector<128x32xf32> -> vector<32x128xf32>
    %20 = arith.truncf %19 : vector<32x128xf32> to vector<32x128xbf16>
    %21 = arith.truncf %9 : vector<128x32xf32> to vector<128x32xbf16>
    %cst_6 = arith.constant dense<0.000000e+00> : vector<128x128xf32>
    %22 = tpu.matmul %21, %20, %cst_6 {dimension_numbers = #tpu.dot_dimension_numbers<[1], [0], [0], [1], [0, 0, 1, 1], [], []>} : vector<128x32xbf16>, vector<32x128xbf16>, vector<128x128xf32> -> vector<128x128xf32>
    %23 = math.exp %22 : vector<128x128xf32>
    %c0_7 = arith.constant 0 : index
    %c0_8 = arith.constant 0 : index
    %24 = vector.load %arg3[%c0_7, %c0_8] : memref<128x128xf32, #tpu.memory_space<vmem>>, vector<128x128xf32>
    %25 = arith.mulf %23, %24 : vector<128x128xf32>
    %cst_9 = arith.constant dense<0.000000e+00> : vector<128xf32>
    %26 = vector.multi_reduction <add>, %25, %cst_9 [1] : vector<128x128xf32> to vector<128xf32>
    %27 = vector.shape_cast %26 : vector<128xf32> to vector<128x1xf32>
    %28 = math.exp %18 : vector<128x1xf32>
    %29 = arith.subf %27, %28 : vector<128x1xf32>
    %30 = math.log %29 : vector<128x1xf32>
    %31 = arith.subf %30, %18 : vector<128x1xf32>
    %32 = vector.shape_cast %31 : vector<128x1xf32> to vector<1x128x1xf32>
    %cst_10 = arith.constant dense<0.000000e+00> : vector<1xf32>
    %33 = vector.multi_reduction <add>, %32, %cst_10 [1, 2] : vector<1x128x1xf32> to vector<1xf32>
    %34 = vector.shape_cast %33 : vector<1xf32> to vector<1x1x1xf32>
    %35 = vector.extract %34[0, 0, 0] : f32 from vector<1x1x1xf32>
    %cst_11 = arith.constant 7.812500e-03 : f32
    %36 = arith.mulf %35, %cst_11 : f32
    %c0_12 = arith.constant 0 : index
    %c0_13 = arith.constant 0 : index
    %37 = memref.load %arg4[%c0_12, %c0_13] : memref<1x1xf32, #tpu.memory_space<smem>>
    memref.store %36, %arg4[%c0_12, %c0_13] : memref<1x1xf32, #tpu.memory_space<smem>>
    return
  }
  func.func @transform_0(%arg0: i32) -> (i32, i32) {
    %c0_i32 = arith.constant 0 : i32
    %c0_i32_0 = arith.constant 0 : i32
    %c0_i32_1 = arith.constant 0 : i32
    return %c0_i32, %c0_i32_0 : i32, i32
  }
  func.func @transform_1(%arg0: i32) -> (i32, i32) {
    %c0_i32 = arith.constant 0 : i32
    %c0_i32_0 = arith.constant 0 : i32
    %c0_i32_1 = arith.constant 0 : i32
    return %c0_i32, %c0_i32_0 : i32, i32
  }
  func.func @transform_2(%arg0: i32) -> (i32, i32) {
    %c0_i32 = arith.constant 0 : i32
    %c0_i32_0 = arith.constant 0 : i32
    %c0_i32_1 = arith.constant 0 : i32
    return %c0_i32, %c0_i32_0 : i32, i32
  }
  func.func @transform_3(%arg0: i32) -> (i32, i32) {
    %c0_i32 = arith.constant 0 : i32
    %c0_i32_0 = arith.constant 0 : i32
    %c0_i32_1 = arith.constant 0 : i32
    return %c0_i32, %c0_i32_0 : i32, i32
  }
}

</mosaic_0001>

<bundles_post_ra>
// kernel: tpu_custom_call.1
= control target key start
LH: loop header
LB: loop body
LE: loop exit
PB: predicated region body
PF: predicated region fallthrough
CT: control target
= control target key end

     0   :  { %vm64_vm0 = vcmask 261120   ;;  %s2303_s0 = inlined_call_operand.vmem [shape: f32[128,32], index: 0, kind: input, shape index: {}]   ;;  %s2304_s1 = inlined_call_operand.vmem [shape: f32[128,32], index: 1, kind: input, shape index: {}]   ;;  %s2305_s2 = inlined_call_operand.vmem [shape: f32[128,128], index: 2, kind: input, shape index: {}]   ;;  %s2306_s3 = inlined_call_operand.hbm [shape: f32[1,1], index: 3, kind: output, shape index: {}]  }
   0x1   :  { %v1195_v0 = vld [vmem:[%s2304_s1 + $0x20] sm:$0xff]  ;;  %v1200_v1 = vld [vmem:[%s2304_s1 + $0x10] sm:$0xff]  ;;  %v1216_v6 = vld [vmem:[%s2304_s1 + $0x28] sm:$0xff] }
   0x2   :  { %v1205_v2 = vld [vmem:[%s2304_s1] sm:$0xff]  ;;  %v309_v3 = vmul.f32 %v1195_v0, %v1195_v0  ;;  %v307_v4 = vmul.f32 %v1200_v1, %v1200_v1  ;;  %v1221_v7 = vld [vmem:[%s2304_s1 + $0x18] sm:$0xff]  ;;  %v1229_v11 = vld [vmem:[%s2304_s1 + $0x8] sm:$0xff]  ;;  %v310_v12 = vmul.f32 %v1216_v6, %v1216_v6 }
   0x3   :  { %v305_v5 = vmul.f32 %v1205_v2, %v1205_v2  ;;  %v308_v13 = vmul.f32 %v1221_v7, %v1221_v7 }
   0x4   :  { %v333_v8 = vsel %vm64_vm0, %v309_v3, 0.0  ;;  %v327_v9 = vsel %vm64_vm0, %v307_v4, 0.0 }
   0x5   :  { %v321_v10 = vsel %vm64_vm0, %v305_v5, 0.0  ;;  %334 = vadd.xlane.f32.xlu2 %v333_v8  ;;  %328 = vadd.xlane.f32.xlu1 %v327_v9 }
   0x6   :  { %322 = vadd.xlane.f32.xlu0 %v321_v10 }
   0x7   :  { %8 = vsyncpa [#allocation3], 0  ;;  %v306_v14 = vmul.f32 %v1229_v11, %v1229_v11  ;;  %v336_v15 = vsel %vm64_vm0, %v310_v12, 0.0  ;;  %v330_v16 = vsel %vm64_vm0, %v308_v13, 0.0  ;;  %v1243_v18 = vld [vmem:[%s2304_s1 + $0x40] sm:$0xff]  ;;  %v1248_v19 = vld [vmem:[%s2304_s1 + $0x38] sm:$0xff] }
   0x8   :  { %v1253_v20 = vld [vmem:[%s2304_s1 + $0x30] sm:$0xff]  ;;  %v313_v21 = vmul.f32 %v1243_v18, %v1243_v18  ;;  %v312_v22 = vmul.f32 %v1248_v19, %v1248_v19  ;;  %v1267_v27 = vld [vmem:[%s2304_s1 + $0x58] sm:$0xff]  ;;  %v1277_v29 = vld [vmem:[%s2304_s1 + $0x48] sm:$0xff]  ;;  %s965_s7 = sshll.u32 %s2306_s3, 4  ;;  %s1171_s10 = smov [#allocation2]   ;;  %s966_s7 = int_to_ptr.hbm [resolvable:$true] %s965_s7 }
   0x9   :  { %v324_v17 = vsel %vm64_vm0, %v306_v14, 0.0  ;;  %v311_v23 = vmul.f32 %v1253_v20, %v1253_v20  ;;  %2319 = vst [vmem:[#allocation5_spill] sm:$0xff] %v1267_v27  ;;  %v1272_v28 = vld [vmem:[%s2304_s1 + $0x50] sm:$0xff]  ;;  %v316_v30 = vmul.f32 %v1267_v27, %v1267_v27  ;;  %v314_v32 = vmul.f32 %v1277_v29, %v1277_v29  ;;  %v45_v37 = vld [vmem:[%s2304_s1 + $0x68] sm:$0xff]  ;;  %v1297_v38 = vld [vmem:[%s2304_s1 + $0x60] sm:$0xff] }
   0xa   :  { %v345_v24 = vsel %vm64_vm0, %v313_v21, 0.0  ;;  %v342_v25 = vsel %vm64_vm0, %v312_v22, 0.0  ;;  %2320 = vst [vmem:[#allocation6_spill] sm:$0xff] %v1272_v28  ;;  %v315_v31 = vmul.f32 %v1272_v28, %v1272_v28  ;;  %v46_v36 = vld [vmem:[%s2304_s1 + $0x70] sm:$0xff]  ;;  %v318_v40 = vmul.f32 %v45_v37, %v45_v37  ;;  %v1307_v45 = vld [vmem:[%s2303_s0 + $0x8] sm:$0xff]  ;;  %v1312_v46 = vld [vmem:[%s2303_s0] sm:$0xff] }
   0xb   :  { %v339_v26 = vsel %vm64_vm0, %v311_v23, 0.0  ;;  %v354_v33 = vsel %vm64_vm0, %v316_v30, 0.0  ;;  %v348_v35 = vsel %vm64_vm0, %v314_v32, 0.0  ;;  %2321 = vst [vmem:[#allocation7_spill] sm:$0xff] %v1297_v38  ;;  %v319_v39 = vmul.f32 %v46_v36, %v46_v36  ;;  %v47_v47 = vld [vmem:[%s2304_s1 + $0x78] sm:$0xff]  ;;  %v1327_v54 = vld [vmem:[%s2303_s0 + $0x40] sm:$0xff] }
   0xc   :  { %v351_v34 = vsel %vm64_vm0, %v315_v31, 0.0  ;;  %v317_v41 = vmul.f32 %v1297_v38, %v1297_v38  ;;  %v360_v43 = vsel %vm64_vm0, %v318_v40, 0.0  ;;  %v49_v48 = vmul.f32 %v1307_v45, %v1307_v45  ;;  %v1332_v55 = vld [vmem:[%s2303_s0 + $0x28] sm:$0xff]  ;;  %v1337_v56 = vld [vmem:[%s2303_s0 + $0x20] sm:$0xff]  ;;  %v1351_v63 = vld [vmem:[%s2303_s0 + $0x18] sm:$0xff] }
   0xd   :  { %337 = vadd.xlane.f32.xlu2 %v336_v15  ;;  %331 = vadd.xlane.f32.xlu1 %v330_v16  ;;  %v363_v42 = vsel %vm64_vm0, %v319_v39, 0.0  ;;  %v48_v49 = vmul.f32 %v1312_v46, %v1312_v46  ;;  %v320_v50 = vmul.f32 %v47_v47, %v47_v47  ;;  %v56_v57 = vmul.f32 %v1327_v54, %v1327_v54  ;;  %v1356_v3 = vld [vmem:[%s2303_s0 + $0x10] sm:$0xff]  ;;  %v1361_v4 = vld [vmem:[%s2303_s0 + $0x48] sm:$0xff]  ;;  %v1385_v16 = vld [vmem:[%s2303_s0 + $0x60] sm:$0xff] }
   0xe   :  { %325 = vadd.xlane.f32.xlu0 %v324_v17  ;;  %v357_v44 = vsel %vm64_vm0, %v317_v41, 0.0  ;;  %v68_v51 = vsel %vm64_vm0, %v49_v48, 0.0  ;;  %v53_v58 = vmul.f32 %v1332_v55, %v1332_v55  ;;  %v52_v59 = vmul.f32 %v1337_v56, %v1337_v56  ;;  %2322 = vst [vmem:[#allocation8_spill] sm:$0xff] %v1361_v4  ;;  %v1375_v14 = vld [vmem:[%s2303_s0 + $0x30] sm:$0xff]  ;;  %v1380_v15 = vld [vmem:[%s2303_s0 + $0x68] sm:$0xff]  ;;  %v1409_v31 = vld [vmem:[%s2303_s0 + $0x38] sm:$0xff] }
   0xf   :  { %v65_v52 = vsel %vm64_vm0, %v48_v49, 0.0  ;;  %v366_v53 = vsel %vm64_vm0, %v320_v50, 0.0  ;;  %v89_v60 = vsel %vm64_vm0, %v56_v57, 0.0  ;;  %v51_v5 = vmul.f32 %v1351_v63, %v1351_v63  ;;  %2323 = vst [vmem:[#allocation9_spill] sm:$0xff] %v1380_v15  ;;  %v1404_v30 = vld [vmem:[%s2303_s0 + $0x50] sm:$0xff]  ;;  %v31_v39 = vld [vmem:[%s2303_s0 + $0x78] sm:$0xff] }
  0x10   :  { %v80_v61 = vsel %vm64_vm0, %v53_v58, 0.0  ;;  %v77_v62 = vsel %vm64_vm0, %v52_v59, 0.0  ;;  %v50_v8 = vmul.f32 %v1356_v3, %v1356_v3  ;;  %v57_v9 = vmul.f32 %v1361_v4, %v1361_v4  ;;  %2324 = vst [vmem:[#allocation10_spill] sm:$0xff] %v1385_v16  ;;  %v30_v40 = vld [vmem:[%s2303_s0 + $0x70] sm:$0xff] }
  0x11   :  { %v74_v10 = vsel %vm64_vm0, %v51_v5, 0.0  ;;  %v54_v17 = vmul.f32 %v1375_v14, %v1375_v14  ;;  %v61_v21 = vmul.f32 %v1380_v15, %v1380_v15  ;;  %v60_v22 = vmul.f32 %v1385_v16, %v1385_v16  ;;  %2326 = vst [vmem:[#allocation12_spill] sm:$0xff] %v1404_v30 }
  0x12   :  { %v71_v12 = vsel %vm64_vm0, %v50_v8, 0.0  ;;  %v92_v13 = vsel %vm64_vm0, %v57_v9, 0.0  ;;  %v63_v41 = vmul.f32 %v31_v39, %v31_v39 }
  0x13   :  { %v83_v23 = vsel %vm64_vm0, %v54_v17, 0.0 }
  0x15   :  { %346 = vadd.xlane.f32.xlu2 %v345_v24  ;;  %343 = vadd.xlane.f32.xlu1 %v342_v25  ;;  %v104_v24 = vsel %vm64_vm0, %v61_v21, 0.0  ;;  %v101_v25 = vsel %vm64_vm0, %v60_v22, 0.0 }
  0x16   :  { %340 = vadd.xlane.f32.xlu0 %v339_v26  ;;  %v1399_v26 = vld [vmem:[%s2303_s0 + $0x58] sm:$0xff] }
  0x17   :  { %2325 = vst [vmem:[#allocation11_spill] sm:$0xff] %v1399_v26  ;;  %v59_v32 = vmul.f32 %v1399_v26, %v1399_v26 }
  0x1d   :  { %355 = vadd.xlane.f32.xlu2 %v354_v33  ;;  %352 = vadd.xlane.f32.xlu1 %v351_v34  ;;  %v58_v33 = vmul.f32 %v1404_v30, %v1404_v30  ;;  %v55_v34 = vmul.f32 %v1409_v31, %v1409_v31 }
  0x1e   :  { %349 = vadd.xlane.f32.xlu0 %v348_v35  ;;  %v98_v35 = vsel %vm64_vm0, %v59_v32, 0.0 }
  0x1f   :  { %v95_v36 = vsel %vm64_vm0, %v58_v33, 0.0  ;;  %v86_v37 = vsel %vm64_vm0, %v55_v34, 0.0 }
  0x25   :  { %364 = vadd.xlane.f32.xlu2 %v363_v42  ;;  %361 = vadd.xlane.f32.xlu1 %v360_v43  ;;  %v62_v42 = vmul.f32 %v30_v40, %v30_v40  ;;  %v110_v43 = vsel %vm64_vm0, %v63_v41, 0.0 }
  0x26   :  { %358 = vadd.xlane.f32.xlu0 %v357_v44 }
  0x27   :  { %v107_v44 = vsel %vm64_vm0, %v62_v42, 0.0 }
  0x2d   :  { %69 = vadd.xlane.f32.xlu2 %v68_v51  ;;  %66 = vadd.xlane.f32.xlu1 %v65_v52 }
  0x2e   :  { %367 = vadd.xlane.f32.xlu0 %v366_v53 }
  0x35   :  { %90 = vadd.xlane.f32.xlu2 %v89_v60  ;;  %81 = vadd.xlane.f32.xlu1 %v80_v61 }
  0x36   :  { %78 = vadd.xlane.f32.xlu0 %v77_v62 }
  0x3d   :  { %75 = vadd.xlane.f32.xlu2 %v74_v10  ;;  %72 = vadd.xlane.f32.xlu1 %v71_v12 }
  0x3e   :  { %93 = vadd.xlane.f32.xlu0 %v92_v13 }
  0x45   :  { %84 = vadd.xlane.f32.xlu2 %v83_v23  ;;  %105 = vadd.xlane.f32.xlu1 %v104_v24 }
  0x46   :  { %102 = vadd.xlane.f32.xlu0 %v101_v25 }
  0x4d   :  { %99 = vadd.xlane.f32.xlu2 %v98_v35  ;;  %96 = vadd.xlane.f32.xlu1 %v95_v36 }
  0x4e   :  { %87 = vadd.xlane.f32.xlu0 %v86_v37 }
  0x55   :  { %111 = vadd.xlane.f32.xlu2 %v110_v43  ;;  %108 = vadd.xlane.f32.xlu1 %v107_v44 }
  0x78   :  { %v1428_v47 = vpop.xlane.xlu2 %334  ;;  %v329_v48 = vpop.xlane.xlu1 %328 }
  0x79   :  { %v323_v49 = vpop.xlane.xlu0 %322  ;;  %vm395_vm7 = vweird.f32 %v329_v48  ;;  %vm415_vm13 = vweird.f32 %v1428_v47 }
  0x7a   :  { %992 = vrsqrt.f32 %v323_v49  ;;  %vm375_vm2 = vweird.f32 %v323_v49 }
  0x7b   :  { %994 = vrsqrt.f32 %v329_v48 }
  0x80   :  { %v1430_v50 = vpop.xlane.xlu2 %337  ;;  %v1432_v51 = vpop.xlane.xlu1 %331 }
  0x81   :  { %v993_v52 = vpop.eup %992  ;;  %v326_v53 = vpop.xlane.xlu0 %325  ;;  %vm405_vm10 = vweird.f32 %v1432_v51 }
  0x82   :  { %v370_v57 = vmul.f32 %v993_v52, %v323_v49  ;;  %996 = vrsqrt.f32 %v326_v53  ;;  %v995_v59 = vpop.eup %994  ;;  %vm376_vm1 = vweird.f32 %v993_v52  ;;  %vm385_vm5 = vweird.f32 %v326_v53 }
  0x83   :  { %998 = vrsqrt.f32 %v1432_v51  ;;  %v390_v61 = vmul.f32 %v995_v59, %v329_v48  ;;  %vm377_vm3 = vmor %vm375_vm2, %vm376_vm1  ;;  %vm396_vm8 = vweird.f32 %v995_v59  ;;  %vm425_vm1 = vweird.f32 %v1430_v50 }
  0x84   :  { %v371_v58 = vmul.f32 %v993_v52, %v370_v57  ;;  %1000 = vrsqrt.f32 %v1428_v47  ;;  %vm397_vm9 = vmor %vm395_vm7, %vm396_vm8 }
  0x85   :  { %v391_v13 = vmul.f32 %v995_v59, %v390_v61  ;;  %1002 = vrsqrt.f32 %v1430_v50 }
  0x86   :  { %v372_v60 = vmul.f32 0.5, %v371_v58 }
  0x87   :  { %v392_v32 = vmul.f32 0.5, %v391_v13 }
  0x88   :  { %v373_v62 = vsub.f32 1.5, %v372_v60  ;;  %v1435_v5 = vpop.xlane.xlu2 %346  ;;  %v1437_v8 = vpop.xlane.xlu1 %343 }
  0x89   :  { %v997_v9 = vpop.eup %996  ;;  %v1439_v10 = vpop.xlane.xlu0 %340 }
  0x8a   :  { %v380_v12 = vmul.f32 %v997_v9, %v326_v53  ;;  %v374_v21 = vmul.f32 %v993_v52, %v373_v62  ;;  %v1441_v22 = vpop.eup %998  ;;  %vm386_vm4 = vweird.f32 %v997_v9  ;;  %1004 = vrsqrt.f32 %v1439_v10 }
  0x8b   :  { %v400_v33 = vmul.f32 %v1441_v22, %v1432_v51  ;;  %vm387_vm6 = vmor %vm385_vm5, %vm386_vm4  ;;  %v1456_v40 = vpop.eup %1000  ;;  %1006 = vrsqrt.f32 %v1435_v5  ;;  %vm406_vm11 = vweird.f32 %v1441_v22  ;;  %vm435_vm8 = vweird.f32 %v1439_v10 }
  0x8c   :  { %v381_v17 = vmul.f32 %v997_v9, %v380_v12  ;;  %v378_v24 = vsel %vm377_vm3, %v993_v52, %v374_v21  ;;  %v410_v44 = vmul.f32 %v1456_v40, %v1428_v47  ;;  %v1474_v61 = vpop.eup %1002  ;;  %1008 = vrsqrt.f32 %v1437_v8  ;;  %vm1492_vm12 = vmor %vm405_vm10, %vm406_vm11 }
  0x8d   :  { %v1445_v25 = vmul.f32 %v378_v24, %v1205_v2  ;;  %v393_v2 = vsub.f32 1.5, %v392_v32  ;;  %v401_v41 = vmul.f32 %v1441_v22, %v400_v33  ;;  %v420_v13 = vmul.f32 %v1474_v61, %v1430_v50 }
  0x8e   :  { %v382_v23 = vmul.f32 0.5, %v381_v17  ;;  %vm416_vm14 = vweird.f32 %v1456_v40  ;;  %vm426_vm2 = vweird.f32 %v1474_v61 }
  0x8f   :  { %609 = vxpose.xlu0.b32.start [1/16] (narrow) %v1445_v25, 32  ;;  %v394_v49 = vmul.f32 %v995_v59, %v393_v2  ;;  %v402_v52 = vmul.f32 0.5, %v401_v41  ;;  %v421_v33 = vmul.f32 %v1474_v61, %v420_v13  ;;  %vm1522_vm15 = vmor %vm415_vm13, %vm416_vm14 }
  0x90   :  { %v383_v34 = vsub.f32 1.5, %v382_v23  ;;  %v1449_v35 = vpop.xlane.xlu2 %355  ;;  %v1451_v36 = vpop.xlane.xlu1 %352  ;;  %vm1575_vm7 = vmor %vm425_vm1, %vm426_vm2 }
  0x91   :  { %v1454_v37 = vpop.xlane.xlu0 %349  ;;  %v403_v48 = vsub.f32 1.5, %v402_v52  ;;  %v398_v60 = vsel %vm397_vm9, %v995_v59, %v394_v49  ;;  %v1483_v12 = vpop.eup %1004  ;;  %v422_v52 = vmul.f32 0.5, %v421_v33 }
  0x92   :  { %v384_v39 = vmul.f32 %v997_v9, %v383_v34  ;;  %v430_v32 = vmul.f32 %v1483_v12, %v1439_v10  ;;  %vm436_vm9 = vweird.f32 %v1483_v12 }
  0x93   :  { %v404_v59 = vmul.f32 %v1441_v22, %v403_v48  ;;  %v423_v33 = vsub.f32 1.5, %v422_v52  ;;  %vm1620_vm13 = vmor %vm435_vm8, %vm436_vm9 }
  0x94   :  { %v388_v42 = vsel %vm387_vm6, %v997_v9, %v384_v39  ;;  %v1481_v9 = vmul.f32 %v398_v60, %v1200_v1  ;;  %v1500_v1 = vpop.eup %1006 }
  0x95   :  { %v1460_v43 = vmul.f32 %v388_v42, %v1229_v11  ;;  %v411_v11 = vmul.f32 %v1456_v40, %v410_v44  ;;  %v408_v34 = vsel %vm1492_vm12, %v1441_v22, %v404_v59  ;;  %v1509_v39 = vpop.eup %1008  ;;  %v450_v2 = vmul.f32 %v1500_v1, %v1435_v5 }
  0x96   :  { %v431_v44 = vmul.f32 %v1483_v12, %v430_v32  ;;  %v1520_v49 = vmul.f32 %v408_v34, %v1221_v7  ;;  %v440_v47 = vmul.f32 %v1509_v39, %v1437_v8  ;;  %vm455_vm12 = vweird.f32 %v1435_v5 }
  0x97   :  { %610 = vxpose.xlu0.b32.cont [2/16] (narrow) %v1460_v43, 32  ;;  %v412_v62 = vmul.f32 0.5, %v411_v11  ;;  %v451_v13 = vmul.f32 %v1500_v1, %v450_v2  ;;  %vm456_vm14 = vweird.f32 %v1500_v1  ;;  %vm446_vm1 = vweird.f32 %v1509_v39 }
  0x98   :  { %v1465_v53 = vpop.xlane.xlu2 %364  ;;  %v1467_v57 = vpop.xlane.xlu1 %361  ;;  %v432_v51 = vmul.f32 0.5, %v431_v44  ;;  %v441_v34 = vmul.f32 %v1509_v39, %v440_v47  ;;  %v424_v47 = vmul.f32 %v1474_v61, %v423_v33  ;;  %vm1710_vm8 = vmor %vm455_vm12, %vm456_vm14 }
  0x99   :  { %2327 = vst [vmem:[#allocation13_spill] sm:$0xff] %v1465_v53  ;;  %v1470_v58 = vpop.xlane.xlu0 %358  ;;  %v413_v24 = vsub.f32 1.5, %v412_v62  ;;  %v452_v44 = vmul.f32 0.5, %v451_v13 }
  0x9b   :  { %v414_v42 = vmul.f32 %v1456_v40, %v413_v24 }
  0x9d   :  { %v418_v32 = vsel %vm1522_vm15, %v1456_v40, %v414_v42  ;;  %v433_v42 = vsub.f32 1.5, %v432_v51  ;;  %vm445_vm15 = vweird.f32 %v1437_v8 }
  0x9e   :  { %v1556_v30 = vmul.f32 %v418_v32, %v1195_v0  ;;  %vm1723_vm9 = vmor %vm445_vm15, %vm446_vm1  ;;  %vm465_vm15 = vweird.f32 %v1454_v37 }
  0x9f   :  { %611 = vxpose.xlu0.b32.cont [3/16] (narrow) %v1481_v9, 32  ;;  %v434_v38 = vmul.f32 %v1483_v12, %v433_v42 }
  0xa0   :  { %v1488_v17 = vpop.xlane.xlu2 %69  ;;  %v1490_v21 = vpop.xlane.xlu1 %66 }
  0xa1   :  { %v1497_v23 = vpop.xlane.xlu0 %367  ;;  %1010 = vrsqrt.f32 %v1488_v17  ;;  %vm129_vm3 = vweird.f32 %v1488_v17  ;;  %vm119_vm5 = vweird.f32 %v1490_v21 }
  0xa2   :  { %2330 = vst [vmem:[#allocation14_spill] sm:$0xff] %v1497_v23  ;;  %1012 = vrsqrt.f32 %v1490_v21 }
  0xa3   :  { %1014 = vrsqrt.f32 %v1454_v37 }
  0xa4   :  { %1016 = vrsqrt.f32 %v1451_v36 }
  0xa7   :  { %v1515_v41 = vpop.eup %1010  ;;  %612 = vxpose.xlu0.b32.cont [4/16] (narrow) %v1520_v49, 32 }
  0xa8   :  { %v124_v11 = vmul.f32 %v1515_v41, %v1488_v17  ;;  %v1530_v48 = vpop.xlane.xlu2 %90  ;;  %v1532_v60 = vpop.xlane.xlu1 %81  ;;  %vm130_vm4 = vweird.f32 %v1515_v41 }
  0xa9   :  { %v1536_v7 = vpop.xlane.xlu0 %78  ;;  %v1538_v62 = vpop.eup %1012  ;;  %vm1596_vm10 = vmor %vm129_vm3, %vm130_vm4  ;;  %vm169_vm3 = vweird.f32 %v1532_v60 }
  0xaa   :  { %v125_v59 = vmul.f32 %v1515_v41, %v124_v11  ;;  %v114_v24 = vmul.f32 %v1538_v62, %v1490_v21  ;;  %1018 = vrsqrt.f32 %v1536_v7  ;;  %v1558_v40 = vpop.eup %1014  ;;  %vm120_vm6 = vweird.f32 %v1538_v62 }
  0xab   :  { %1020 = vrsqrt.f32 %v1532_v60  ;;  %v1562_v52 = vpop.eup %1016  ;;  %v460_v50 = vmul.f32 %v1558_v40, %v1454_v37  ;;  %vm1607_vm11 = vmor %vm119_vm5, %vm120_vm6  ;;  %vm159_vm2 = vweird.f32 %v1536_v7  ;;  %vm466_vm1 = vweird.f32 %v1558_v40 }
  0xac   :  { %v126_v26 = vmul.f32 0.5, %v125_v59  ;;  %v115_v2 = vmul.f32 %v1538_v62, %v114_v24  ;;  %1022 = vrsqrt.f32 %v1449_v35  ;;  %v442_v59 = vmul.f32 0.5, %v441_v34 }
  0xad   :  { %v470_v10 = vmul.f32 %v1562_v52, %v1451_v36 }
  0xae   :  { %v127_v11 = vsub.f32 1.5, %v126_v26  ;;  %v116_v22 = vmul.f32 0.5, %v115_v2 }
  0xaf   :  { %613 = vxpose.xlu0.b32.cont [5/16] (narrow) %v1556_v30, 32 }
  0xb0   :  { %v1567_v26 = vpop.xlane.xlu2 %75  ;;  %v1569_v0 = vpop.eup %1018  ;;  %v117_v51 = vsub.f32 1.5, %v116_v22  ;;  %v128_v34 = vmul.f32 %v1515_v41, %v127_v11  ;;  %v453_v22 = vsub.f32 1.5, %v452_v44  ;;  %v443_v44 = vsub.f32 1.5, %v442_v59 }
  0xb1   :  { %v1582_v24 = vpop.xlane.xlu0 %93  ;;  %1024 = vrsqrt.f32 %v1567_v26  ;;  %v1585_v32 = vpop.xlane.xlu1 %72  ;;  %v154_v21 = vmul.f32 %v1569_v0, %v1536_v7  ;;  %v461_v59 = vmul.f32 %v1558_v40, %v460_v50  ;;  %v438_v50 = vsel %vm1620_vm13, %v1483_v12, %v434_v38 }
  0xb2   :  { %v1587_v33 = vpop.eup %1020  ;;  %1026 = vrsqrt.f32 %v1530_v48  ;;  %v118_v27 = vmul.f32 %v1538_v62, %v117_v51  ;;  %v428_v51 = vsel %vm1575_vm7, %v1474_v61, %v424_v47  ;;  %v132_v16 = vsel %vm1596_vm10, %v1515_v41, %v128_v34 }
  0xb3   :  { %v164_v17 = vmul.f32 %v1587_v33, %v1532_v60  ;;  %v1613_v23 = vpop.eup %1022  ;;  %1028 = vrsqrt.f32 %v1585_v32  ;;  %v1646_v13 = vmul.f32 %v1500_v1, %v453_v22  ;;  %v1650_v28 = vmul.f32 %v428_v51, %v1216_v6 }
  0xb4   :  { %v122_v61 = vsel %vm1607_vm11, %v1538_v62, %v118_v27  ;;  %1030 = vrsqrt.f32 %v1582_v24  ;;  %v1658_v41 = vmul.f32 %v1509_v39, %v443_v44  ;;  %v480_v27 = vmul.f32 %v1613_v23, %v1449_v35 }
  0xb5   :  { %v165_v15 = vmul.f32 %v1587_v33, %v164_v17  ;;  %v155_v62 = vmul.f32 %v1569_v0, %v154_v21  ;;  %v1668_v6 = vmul.f32 %v1562_v52, %v470_v10  ;;  %v274_v12 = vmul.f32 2.0, %v132_v16 }
  0xb6   :  { %v273_v11 = vmul.f32 2.0, %v122_v61  ;;  %v1676_v44 = vmul.f32 0.5, %v461_v59  ;;  %v1680_v51 = vmul.f32 %v438_v50, %v1253_v20  ;;  %vm149_vm4 = vweird.f32 %v1567_v26 }
  0xb7   :  { %v1643_v47 = vpop.eup %1024  ;;  %614 = vxpose.xlu0.b32.cont [6/16] (narrow) %v1650_v28, 32  ;;  %v166_v42 = vmul.f32 0.5, %v165_v15  ;;  %v156_v61 = vmul.f32 0.5, %v155_v62  ;;  %vm139_vm5 = vweird.f32 %v1585_v32  ;;  %vm170_vm6 = vweird.f32 %v1587_v33 }
  0xb8   :  { %v1655_v2 = vpop.eup %1026  ;;  %v144_v34 = vmul.f32 %v1643_v47, %v1567_v26  ;;  %v1665_v22 = vpop.xlane.xlu2 %84  ;;  %v1695_v59 = vmul.f32 %v274_v12, %v1307_v45  ;;  %v1698_v50 = vmul.f32 %v273_v11, %v1312_v46  ;;  %vm150_vm7 = vweird.f32 %v1643_v47  ;;  %vm1736_vm11 = vmor %vm169_vm3, %vm170_vm6 }
  0xb9   :  { %v1671_v38 = vpop.xlane.xlu0 %102  ;;  %1032 = vrsqrt.f32 %v1665_v22  ;;  %v1674_v17 = vpop.eup %1028  ;;  %v194_v10 = vmul.f32 %v1655_v2, %v1530_v48  ;;  %v157_v5 = vsub.f32 1.5, %v156_v61  ;;  %vm160_vm12 = vweird.f32 %v1569_v0  ;;  %vm1753_vm13 = vmor %vm149_vm4, %vm150_vm7 }
  0xba   :  { %v145_v21 = vmul.f32 %v1643_v47, %v144_v34  ;;  %v134_v16 = vmul.f32 %v1674_v17, %v1585_v32  ;;  %v1690_v15 = vpop.eup %1030  ;;  %2341 = vst [vmem:[#allocation15_spill] sm:$0xff] %v1695_v59  ;;  %v167_v34 = vsub.f32 1.5, %v166_v42  ;;  %1034 = vrsqrt.f32 %v1671_v38  ;;  %v1702_v62 = vpop.xlane.xlu1 %105  ;;  %vm1795_vm3 = vmor %vm159_vm2, %vm160_vm12 }
  0xbb   :  { %2342 = vst [vmem:[#allocation16_spill] sm:$0xff] %v1698_v50  ;;  %1036 = vrsqrt.f32 %v1702_v62  ;;  %v545_v12 = vmul.f32 %v1445_v25, %v1698_v50  ;;  %v204_v42 = vmul.f32 %v1690_v15, %v1582_v24  ;;  %vm140_vm10 = vweird.f32 %v1674_v17 }
  0xbc   :  { %v146_v53 = vmul.f32 0.5, %v145_v21  ;;  %v135_v20 = vmul.f32 %v1674_v17, %v134_v16  ;;  %v195_v50 = vmul.f32 %v1655_v2, %v194_v10  ;;  %v168_v60 = vmul.f32 %v1587_v33, %v167_v34  ;;  %vm1767_vm14 = vmor %vm139_vm5, %vm140_vm10 }
  0xbd   :  { %v448_v32 = vsel %vm1723_vm9, %v1509_v39, %v1658_v41  ;;  %v205_v39 = vmul.f32 %v1690_v15, %v204_v42  ;;  %vm199_vm2 = vweird.f32 %v1530_v48  ;;  %vm179_vm4 = vweird.f32 %v1665_v22  ;;  %vm1865_vm10 = vmor %vm465_vm15, %vm466_vm1  ;;  %v2374_v48 = vld [vmem:[#allocation10_spill] sm:$0xff] }
  0xbe   :  { %v147_v4 = vsub.f32 1.5, %v146_v53  ;;  %v136_v46 = vmul.f32 0.5, %v135_v20  ;;  %v546_v53 = vmul.f32 %v1460_v43, %v1695_v59  ;;  %v561_v20 = vsel %vm64_vm0, %v545_v12, 0.0 }
  0xbf   :  { %v1704_v21 = vpop.eup %1032  ;;  %615 = vxpose.xlu0.b32.cont [7/16] (narrow) %v1680_v51, 32  ;;  %562 = vadd.xlane.f32.xlu1 %v561_v20  ;;  %v463_v12 = vsub.f32 1.5, %v1676_v44  ;;  %v172_v7 = vsel %vm1736_vm11, %v1587_v33, %v168_v60  ;;  %v1813_v11 = vmul.f32 %v448_v32, %v1248_v19  ;;  %v206_v19 = vmul.f32 0.5, %v205_v39 }
  0xc0   :  { %v174_v43 = vmul.f32 %v1704_v21, %v1665_v22  ;;  %v148_v8 = vmul.f32 %v1643_v47, %v147_v4  ;;  %v137_v16 = vsub.f32 1.5, %v136_v46  ;;  %v564_v61 = vsel %vm64_vm0, %v546_v53, 0.0  ;;  %v1772_v34 = vpop.eup %1034 }
  0xc1   :  { %v1744_v59 = vpop.xlane.xlu0 %87  ;;  %565 = vadd.xlane.f32.xlu2 %v564_v61  ;;  %v1759_v53 = vmul.f32 %v1613_v23, %v480_v27  ;;  %v158_v27 = vmul.f32 %v1569_v0, %v157_v5  ;;  %v1788_v61 = vmul.f32 0.5, %v1668_v6  ;;  %v1810_v45 = vmul.f32 %v1558_v40, %v463_v12 }
  0xc2   :  { %v175_v46 = vmul.f32 %v1704_v21, %v174_v43  ;;  %v138_v10 = vmul.f32 %v1674_v17, %v137_v16  ;;  %1038 = vrsqrt.f32 %v1744_v59  ;;  %v458_v43 = vsel %vm1710_vm8, %v1500_v1, %v1646_v13  ;;  %v1785_v16 = vpop.eup %1036 }
  0xc3   :  { %1040 = vrsqrt.f32 %v1470_v58  ;;  %v152_v1 = vsel %vm1753_vm13, %v1643_v47, %v148_v8  ;;  %v196_v13 = vmul.f32 0.5, %v195_v50  ;;  %v1816_v20 = vmul.f32 %v458_v43, %v1243_v18 }
  0xc4   :  { %v176_v44 = vmul.f32 0.5, %v175_v46  ;;  %v276_v41 = vmul.f32 2.0, %v152_v1  ;;  %v142_v6 = vsel %vm1767_vm14, %v1674_v17, %v138_v10  ;;  %v234_v47 = vmul.f32 %v1772_v34, %v1671_v38  ;;  %v2371_v1 = vld [vmem:[#allocation8_spill] sm:$0xff] }
  0xc5   :  { %v275_v42 = vmul.f32 2.0, %v142_v6  ;;  %v244_v17 = vmul.f32 %v1785_v16, %v1702_v62  ;;  %v162_v33 = vsel %vm1795_vm3, %v1569_v0, %v158_v27  ;;  %v278_v8 = vmul.f32 2.0, %v172_v7 }
  0xc6   :  { %v177_v50 = vsub.f32 1.5, %v176_v44  ;;  %v1830_v18 = vmul.f32 %v276_v41, %v1351_v63  ;;  %v197_v60 = vsub.f32 1.5, %v196_v13  ;;  %vm180_vm5 = vweird.f32 %v1704_v21 }
  0xc7   :  { %616 = vxpose.xlu0.b32.cont [8/16] (narrow) %v1813_v11, 32  ;;  %vm200_vm6 = vweird.f32 %v1655_v2  ;;  %v1842_v12 = vmul.f32 %v275_v42, %v1356_v3  ;;  %v277_v63 = vmul.f32 2.0, %v162_v33  ;;  %v235_v10 = vmul.f32 %v1772_v34, %v234_v47  ;;  %vm1848_vm7 = vmor %vm179_vm4, %vm180_vm5 }
  0xc8   :  { %v1825_v25 = vpop.eup %1038  ;;  %v548_v46 = vmul.f32 %v1520_v49, %v1830_v18  ;;  %v178_v22 = vmul.f32 %v1704_v21, %v177_v50  ;;  %v245_v26 = vmul.f32 %v1785_v16, %v244_v17  ;;  %v207_v44 = vsub.f32 1.5, %v206_v19  ;;  %vm1881_vm13 = vmor %vm199_vm2, %vm200_vm6 }
  0xc9   :  { %v184_v4 = vmul.f32 %v1825_v25, %v1744_v59  ;;  %v1836_v0 = vpop.eup %1040  ;;  %v547_v3 = vmul.f32 %v1481_v9, %v1842_v12  ;;  %v1856_v49 = vmul.f32 %v278_v8, %v1332_v55  ;;  %v198_v5 = vmul.f32 %v1655_v2, %v197_v60  ;;  %v1871_v55 = vpop.xlane.xlu1 %96 }
  0xca   :  { %v570_v43 = vsel %vm64_vm0, %v548_v46, 0.0  ;;  %vm209_vm8 = vweird.f32 %v1582_v24  ;;  %vm210_vm9 = vweird.f32 %v1690_v15  ;;  %vm189_vm11 = vweird.f32 %v1744_v59 }
  0xcb   :  { %v185_v27 = vmul.f32 %v1825_v25, %v184_v4  ;;  %571 = vadd.xlane.f32.xlu2 %v570_v43  ;;  %vm190_vm12 = vweird.f32 %v1825_v25  ;;  %v567_v9 = vsel %vm64_vm0, %v547_v3, 0.0  ;;  %v1875_v13 = vmul.f32 %v277_v63, %v1337_v56  ;;  %vm1895_vm15 = vmor %vm209_vm8, %vm210_vm9 }
  0xcc   :  { %v236_v41 = vmul.f32 0.5, %v235_v10  ;;  %v246_v6 = vmul.f32 0.5, %v245_v26  ;;  %568 = vadd.xlane.f32.xlu1 %v567_v9  ;;  %v182_v42 = vsel %vm1848_vm7, %v1704_v21, %v178_v22  ;;  %vm475_vm14 = vweird.f32 %v1451_v36  ;;  %vm1909_vm3 = vmor %vm189_vm11, %vm190_vm12 }
  0xcd   :  { %v186_v39 = vmul.f32 0.5, %v185_v27  ;;  %1042 = vrsqrt.f32 %v1467_v57  ;;  %v208_v56 = vmul.f32 %v1690_v15, %v207_v44  ;;  %v550_v47 = vmul.f32 %v1650_v28, %v1856_v49 }
  0xce   :  { %v473_v21 = vsub.f32 1.5, %v1788_v61  ;;  %vm476_vm1 = vweird.f32 %v1562_v52  ;;  %1044 = vrsqrt.f32 %v1871_v55  ;;  %v482_v17 = vmul.f32 0.5, %v1759_v53 }
  0xcf   :  { %v187_v7 = vsub.f32 1.5, %v186_v39  ;;  %617 = vxpose.xlu0.b32.cont [9/16] (narrow) %v1816_v20, 32  ;;  %v549_v28 = vmul.f32 %v1556_v30, %v1875_v13  ;;  %v468_v61 = vsel %vm1865_vm10, %v1558_v40, %v1810_v45  ;;  %v279_v33 = vmul.f32 2.0, %v182_v42  ;;  %vm1944_vm7 = vmor %vm475_vm14, %vm476_vm1  ;;  %v2373_v42 = vld [vmem:[#allocation6_spill] sm:$0xff] }
  0xd0   :  { %v237_v19 = vsub.f32 1.5, %v236_v41  ;;  %vm239_vm2 = vweird.f32 %v1671_v38  ;;  %v247_v59 = vsub.f32 1.5, %v246_v6  ;;  %v202_v8 = vsel %vm1881_vm13, %v1655_v2, %v198_v5 }
  0xd1   :  { %v188_v50 = vmul.f32 %v1825_v25, %v187_v7  ;;  %vm240_vm4 = vweird.f32 %v1772_v34  ;;  %v576_v53 = vsel %vm64_vm0, %v550_v47, 0.0  ;;  %v212_v40 = vsel %vm1895_vm15, %v1690_v15, %v208_v56  ;;  %v1948_v15 = vpop.xlane.xlu2 %99 }
  0xd2   :  { %v474_v45 = vmul.f32 %v1562_v52, %v473_v21  ;;  %v490_v60 = vmul.f32 %v1836_v0, %v1470_v58  ;;  %vm249_vm5 = vweird.f32 %v1702_v62  ;;  %vm250_vm6 = vweird.f32 %v1785_v16  ;;  %vm1964_vm8 = vmor %vm239_vm2, %vm240_vm4  ;;  %v2375_v21 = vld [vmem:[#allocation9_spill] sm:$0xff] }
  0xd3   :  { %v192_v30 = vsel %vm1909_vm3, %v1825_v25, %v188_v50  ;;  %577 = vadd.xlane.f32.xlu2 %v576_v53  ;;  %v1938_v2 = vpop.eup %1042  ;;  %v573_v4 = vsel %vm64_vm0, %v549_v28, 0.0  ;;  %v1952_v46 = vmul.f32 %v468_v61, %v1277_v29  ;;  %v1955_v63 = vmul.f32 %v279_v33, %v1375_v14  ;;  %vm1973_vm9 = vmor %vm249_vm5, %vm250_vm6 }
  0xd4   :  { %v281_v10 = vmul.f32 2.0, %v202_v8  ;;  %v1957_v22 = vpop.eup %1044  ;;  %v238_v26 = vmul.f32 %v1772_v34, %v237_v19  ;;  %v248_v27 = vmul.f32 %v1785_v16, %v247_v59  ;;  %574 = vadd.xlane.f32.xlu1 %v573_v4  ;;  %v280_v29 = vmul.f32 2.0, %v192_v30  ;;  %v2377_v4 = vld [vmem:[#allocation5_spill] sm:$0xff] }
  0xd5   :  { %v282_v44 = vmul.f32 2.0, %v212_v40  ;;  %v483_v38 = vsub.f32 1.5, %v482_v17  ;;  %vm485_vm10 = vweird.f32 %v1449_v35  ;;  %v491_v32 = vmul.f32 %v1836_v0, %v490_v60  ;;  %v2376_v60 = vld [vmem:[#allocation14_spill] sm:$0xff] }
  0xd6   :  { %1046 = vrsqrt.f32 %v1948_v15  ;;  %v214_v43 = vmul.f32 %v1957_v22, %v1871_v55  ;;  %v551_v3 = vmul.f32 %v1680_v51, %v1955_v63  ;;  %v478_v62 = vsel %vm1944_vm7, %v1562_v52, %v474_v45  ;;  %v2372_v52 = vld [vmem:[#allocation13_spill] sm:$0xff] }
  0xd7   :  { %618 = vxpose.xlu0.b32.cont [10/16] (narrow) %v1952_v46, 32  ;;  %v1989_v5 = vmul.f32 %v281_v10, %v1327_v54  ;;  %v1992_v39 = vmul.f32 %v280_v29, %v1409_v31  ;;  %v1995_v9 = vmul.f32 %v282_v44, %v2371_v1  ;;  %v242_v37 = vsel %vm1964_vm8, %v1772_v34, %v238_v26 }
  0xd8   :  { %v252_v51 = vsel %vm1973_vm9, %v1785_v16, %v248_v27  ;;  %vm486_vm11 = vweird.f32 %v1613_v23  ;;  %1048 = vrsqrt.f32 %v2372_v52  ;;  %v285_v54 = vmul.f32 2.0, %v242_v37 }
  0xd9   :  { %v286_v41 = vmul.f32 2.0, %v252_v51  ;;  %v500_v31 = vmul.f32 %v1938_v2, %v1467_v57  ;;  %v645_v6 = vpack.c.bf16 %v1856_v49, %v1875_v13  ;;  %v647_v7 = vpack.c.bf16 %v1995_v9, %v1989_v5  ;;  %vm487_vm12 = vmor %vm485_vm10, %vm486_vm11  ;;  %v1155_v49 = vld [vmem:[%s2303_s0 + $0x70] sm:$0xff] }
  0xda   :  { %v646_v34 = vpack.c.bf16 %v1992_v39, %v1955_v63  ;;  %v579_v16 = vsel %vm64_vm0, %v551_v3, 0.0  ;;  %v2015_v56 = vmul.f32 %v478_v62, %v2373_v42  ;;  %v2018_v47 = vmul.f32 %v285_v54, %v2374_v48  ;;  %v2382_v62 = vld [vmem:[#allocation7_spill] sm:$0xff]  ;;  %v760_v63 = vld [vmem:[%s2305_s2 + $0x20] sm:$0xff] }
  0xdb   :  { %v2021_v50 = vmul.f32 %v286_v41, %v2375_v21  ;;  %v484_v17 = vmul.f32 %v1613_v23, %v483_v38  ;;  %v492_v28 = vmul.f32 0.5, %v491_v32  ;;  %v215_v61 = vmul.f32 %v1957_v22, %v214_v43 }
  0xdc   :  { %v2023_v24 = vpop.eup %1046  ;;  %580 = vadd.xlane.f32.xlu1 %v579_v16  ;;  %v501_v59 = vmul.f32 %v1938_v2, %v500_v31  ;;  %v552_v8 = vmul.f32 %v1813_v11, %v1992_v39  ;;  %vm495_vm13 = vweird.f32 %v1470_v58  ;;  %vm496_vm14 = vweird.f32 %v1836_v0 }
  0xdd   :  { %v649_v33 = vpack.c.bf16 %v2021_v50, %v2018_v47  ;;  %v493_v53 = vsub.f32 1.5, %v492_v28  ;;  %v224_v30 = vmul.f32 %v2023_v24, %v1948_v15  ;;  %v216_v40 = vmul.f32 0.5, %v215_v61  ;;  %vm2053_vm15 = vmor %vm495_vm13, %vm496_vm14 }
  0xde   :  { %v2034_v19 = vpop.eup %1048  ;;  %v488_v35 = vsel %vm487_vm12, %v1613_v23, %v484_v17  ;;  %1050 = vrsqrt.f32 %v2376_v60  ;;  %v582_v25 = vsel %vm64_vm0, %v552_v8, 0.0  ;;  %v502_v10 = vmul.f32 0.5, %v501_v59 }
  0xdf   :  { %619 = vxpose.xlu0.b32.cont [11/16] (narrow) %v2015_v56, 32  ;;  %v510_v45 = vmul.f32 %v2034_v19, %v2372_v52  ;;  %v2049_v11 = vmul.f32 %v488_v35, %v2377_v4  ;;  %v494_v26 = vmul.f32 %v1836_v0, %v493_v53  ;;  %v225_v36 = vmul.f32 %v2023_v24, %v224_v30  ;;  %v1154_v4 = vld [vmem:[%s2304_s1 + $0x78] sm:$0xff] }
  0xe0   :  { %v217_v23 = vsub.f32 1.5, %v216_v40  ;;  %vm219_vm1 = vweird.f32 %v1871_v55  ;;  %vm220_vm3 = vweird.f32 %v1957_v22  ;;  %v553_v29 = vmul.f32 %v1816_v20, %v1989_v5  ;;  %v1153_v40 = vld [vmem:[%s2304_s1 + $0x70] sm:$0xff]  ;;  %v1156_v5 = vld [vmem:[%s2303_s0 + $0x78] sm:$0xff] }
  0xe1   :  { %v511_v27 = vmul.f32 %v2034_v19, %v510_v45  ;;  %v503_v44 = vsub.f32 1.5, %v502_v10  ;;  %v226_v14 = vmul.f32 0.5, %v225_v36  ;;  %v498_v32 = vsel %vm2053_vm15, %v1836_v0, %v494_v26  ;;  %vm2067_vm2 = vmor %vm219_vm1, %vm220_vm3 }
  0xe2   :  { %v218_v38 = vmul.f32 %v1957_v22, %v217_v23  ;;  %vm505_vm4 = vweird.f32 %v1467_v57  ;;  %vm506_vm5 = vweird.f32 %v1938_v2  ;;  %v585_v20 = vsel %vm64_vm0, %v553_v29, 0.0  ;;  %v109_v29 = vpop.xlane.xlu1 %108 }
  0xe3   :  { %v512_v55 = vmul.f32 0.5, %v511_v27  ;;  %v541_v1 = vmul.f32 %v498_v32, %v2382_v62  ;;  %v504_v37 = vmul.f32 %v1938_v2, %v503_v44  ;;  %v227_v54 = vsub.f32 1.5, %v226_v14  ;;  %vm507_vm6 = vmor %vm505_vm4, %vm506_vm5  ;;  %v112_v27 = vpop.xlane.xlu2 %111 }
  0xe4   :  { %583 = vadd.xlane.f32.xlu1 %v582_v25  ;;  %v1051_v43 = vpop.eup %1050  ;;  %v222_v0 = vsel %vm2067_vm2, %v1957_v22, %v218_v38  ;;  %vm229_vm7 = vweird.f32 %v1948_v15  ;;  %vm230_vm8 = vweird.f32 %v2023_v24  ;;  %v554_v57 = vmul.f32 %v1952_v46, %v1995_v9  ;;  %v1152_v15 = vld [vmem:[%s2304_s1 + $0x68] sm:$0xff]  ;;  %v2383_v46 = vld [vmem:[#allocation12_spill] sm:$0xff] }
  0xe5   :  { %v520_v51 = vmul.f32 %v1051_v43, %v2376_v60  ;;  %v283_v41 = vmul.f32 2.0, %v222_v0  ;;  %v513_v31 = vsub.f32 1.5, %v512_v55  ;;  %v228_v42 = vmul.f32 %v2023_v24, %v227_v54  ;;  %vm231_vm9 = vmor %vm229_vm7, %vm230_vm8 }
  0xe6   :  { %v508_v48 = vsel %vm507_vm6, %v1938_v2, %v504_v37  ;;  %vm515_vm10 = vweird.f32 %v2372_v52  ;;  %vm516_vm11 = vweird.f32 %v2034_v19  ;;  %v588_v22 = vsel %vm64_vm0, %v554_v57, 0.0 }
  0xe7   :  { %620 = vxpose.xlu0.b32.cont [12/16] (narrow) %v2049_v11, 32  ;;  %v521_v16 = vmul.f32 %v1051_v43, %v520_v51  ;;  %v542_v21 = vmul.f32 %v1152_v15, %v508_v48  ;;  %v2093_v17 = vmul.f32 %v283_v41, %v2383_v46  ;;  %v514_v28 = vmul.f32 %v2034_v19, %v513_v31  ;;  %vm517_vm12 = vmor %vm515_vm10, %vm516_vm11  ;;  %v2385_v41 = vld [vmem:[#allocation16_spill] sm:$0xff]  ;;  %v2386_v31 = vld [vmem:[#allocation15_spill] sm:$0xff] }
  0xe8   :  { %v232_v2 = vsel %vm231_vm9, %v2023_v24, %v228_v42  ;;  %vm525_vm13 = vweird.f32 %v2376_v60  ;;  %vm526_vm14 = vweird.f32 %v1051_v43  ;;  %v2384_v24 = vld [vmem:[#allocation11_spill] sm:$0xff]  ;;  %v557_v26 = vmul.f32 %v541_v1, %v2018_v47 }
  0xe9   :  { %v522_v61 = vmul.f32 0.5, %v521_v16  ;;  %v555_v52 = vmul.f32 %v2015_v56, %v2093_v17  ;;  %v284_v59 = vmul.f32 2.0, %v232_v2  ;;  %v518_v53 = vsel %vm517_vm12, %v2034_v19, %v514_v28  ;;  %vm527_vm15 = vmor %vm525_vm13, %vm526_vm14 }
  0xea   :  { %v2105_v35 = vmul.f32 %v1153_v40, %v518_v53  ;;  %v597_v36 = vsel %vm64_vm0, %v557_v26, 0.0  ;;  %v558_v23 = vmul.f32 %v542_v21, %v2021_v50  ;;  %1052 = vrsqrt.f32 %v112_v27 }
  0xeb   :  { %v523_v8 = vsub.f32 1.5, %v522_v61  ;;  %v591_v30 = vsel %vm64_vm0, %v555_v52, 0.0  ;;  %v2108_v45 = vmul.f32 %v284_v59, %v2384_v24  ;;  %1054 = vrsqrt.f32 %v109_v29 }
  0xec   :  { %586 = vadd.xlane.f32.xlu1 %v585_v20  ;;  %vm269_vm1 = vweird.f32 %v112_v27  ;;  %vm259_vm2 = vweird.f32 %v109_v29  ;;  %v643_v16 = vpack.c.bf16 %v2386_v31, %v2385_v41  ;;  %v644_v47 = vpack.c.bf16 %v1830_v18, %v1842_v12  ;;  %v756_v18 = vld [vmem:[%s2305_s2] sm:$0xff]  ;;  %v769_v31 = vld [vmem:[%s2305_s2 + $0x68] sm:$0xff] }
  0xed   :  { %v524_v25 = vmul.f32 %v1051_v43, %v523_v8  ;;  %v556_v56 = vmul.f32 %v2049_v11, %v2108_v45  ;;  %v600_v11 = vsel %vm64_vm0, %v558_v23, 0.0 }
  0xef   :  { %621 = vxpose.xlu0.b32.cont [13/16] (narrow) %v541_v1, 32  ;;  %v528_v19 = vsel %vm527_vm15, %v1051_v43, %v524_v25  ;;  %v594_v60 = vsel %vm64_vm0, %v556_v56, 0.0 }
  0xf0   :  { %v2117_v10 = vmul.f32 %v1154_v4, %v528_v19  ;;  %v1053_v14 = vpop.eup %1052 }
  0xf1   :  { %v1055_v38 = vpop.eup %1054  ;;  %v264_v43 = vmul.f32 %v1053_v14, %v112_v27  ;;  %vm270_vm3 = vweird.f32 %v1053_v14 }
  0xf2   :  { %v254_v3 = vmul.f32 %v1055_v38, %v109_v29  ;;  %vm260_vm4 = vweird.f32 %v1055_v38  ;;  %vm271_vm5 = vmor %vm269_vm1, %vm270_vm3 }
  0xf3   :  { %v265_v55 = vmul.f32 %v1053_v14, %v264_v43  ;;  %vm261_vm6 = vmor %vm259_vm2, %vm260_vm4 }
  0xf4   :  { %589 = vadd.xlane.f32.xlu1 %v588_v22  ;;  %v255_v20 = vmul.f32 %v1055_v38, %v254_v3 }
  0xf5   :  { %v266_v37 = vmul.f32 0.5, %v265_v55 }
  0xf6   :  { %v256_v51 = vmul.f32 0.5, %v255_v20  ;;  %v770_v20 = vld [vmem:[%s2305_s2 + $0x70] sm:$0xff] }
  0xf7   :  { %622 = vxpose.xlu0.b32.cont [14/16] (narrow) %v542_v21, 32  ;;  %v267_v0 = vsub.f32 1.5, %v266_v37  ;;  %v765_v37 = vld [vmem:[%s2305_s2 + $0x48] sm:$0xff] }
  0xf8   :  { %v257_v57 = vsub.f32 1.5, %v256_v51 }
  0xf9   :  { %v268_v42 = vmul.f32 %v1053_v14, %v267_v0 }
  0xfa   :  { %v258_v48 = vmul.f32 %v1055_v38, %v257_v57 }
  0xfb   :  { %v272_v22 = vsel %vm271_vm5, %v1053_v14, %v268_v42 }
  0xfc   :  { %592 = vadd.xlane.f32.xlu1 %v591_v30  ;;  %v262_v15 = vsel %vm261_vm6, %v1055_v38, %v258_v48  ;;  %v288_v21 = vmul.f32 2.0, %v272_v22 }
  0xfd   :  { %v287_v46 = vmul.f32 2.0, %v262_v15  ;;  %v758_v15 = vld [vmem:[%s2305_s2 + $0x10] sm:$0xff] }
  0xfe   :  { %v304_v9 = vmul.f32 %v1156_v5, %v288_v21  ;;  %v762_v5 = vld [vmem:[%s2305_s2 + $0x30] sm:$0xff] }
  0xff   :  { %623 = vxpose.xlu0.b32.cont [15/16] (narrow) %v2105_v35, 32  ;;  %v303_v13 = vmul.f32 %v1155_v49, %v287_v46 }
 0x100   :  { %v560_v26 = vmul.f32 %v2117_v10, %v304_v9 }
 0x101   :  { %v559_v30 = vmul.f32 %v2105_v35, %v303_v13  ;;  %v757_v35 = vld [vmem:[%s2305_s2 + $0x8] sm:$0xff] }
 0x102   :  { %v606_v27 = vsel %vm64_vm0, %v560_v26, 0.0  ;;  %v771_v26 = vld [vmem:[%s2305_s2 + $0x78] sm:$0xff] }
 0x103   :  { %v603_v19 = vsel %vm64_vm0, %v559_v30, 0.0 }
 0x104   :  { %595 = vadd.xlane.f32.xlu1 %v594_v60 }
 0x107   :  { %624 = vxpose.xlu0.b32.end [16/16] (narrow) %v2117_v10, 32  ;;  %v768_v10 = vld [vmem:[%s2305_s2 + $0x60] sm:$0xff] }
 0x10c   :  { %598 = vadd.xlane.f32.xlu1 %v597_v36 }
 0x114   :  { %601 = vadd.xlane.f32.xlu1 %v600_v11 }
 0x133   :  { %v625_v58 = vpop.trf.xlu0 }
 0x13b   :  { %v626_v44 = vpop.trf.xlu0 }
 0x13c   :  { %v641_v54 = vpack.c.bf16 %v626_v44, %v625_v58 }
 0x143   :  { %v627_v32 = vpop.trf.xlu0 }
 0x14b   :  { %v628_v62 = vpop.trf.xlu0 }
 0x14c   :  { %v642_v1 = vpack.c.bf16 %v628_v62, %v627_v32  ;;  %v761_v32 = vld [vmem:[%s2305_s2 + $0x28] sm:$0xff] }
 0x14e   :  { %681 = vmatpush.bf16.msra.mxu0 %v642_v1  ;;  %983 = vmatpush.bf16.msra.mxu1 %v642_v1 }
 0x14f   :  { %984 = vmatpush.bf16.msra.mxu2 %v642_v1  ;;  %985 = vmatpush.bf16.msra.mxu3 %v642_v1 }
 0x152   :  { %682 = vmatpush.bf16.msra.mxu0 %v641_v54  ;;  %986 = vmatpush.bf16.msra.mxu1 %v641_v54 }
 0x153   :  { %987 = vmatpush.bf16.msra.mxu2 %v641_v54  ;;  %988 = vmatpush.bf16.msra.mxu3 %v641_v54 }
 0x155   :  { %975 = vmatmul.msk.bf16.vlgmr.msra.gmra.mxu0 %vm64_vm0, %v643_v16  ;;  %977 = vmatmul.msk.bf16.vlgmr.msra.gmra.mxu1 %vm64_vm0, %v645_v6  ;;  %v650_v6 = vpack.c.bf16 %v304_v9, %v303_v13  ;;  %v2193_v9 = vpop.xlane.xlu1 %562 }
 0x156   :  { %979 = vmatmul.msk.bf16.vlgmr.msra.gmra.mxu2 %vm64_vm0, %v647_v7  ;;  %981 = vmatmul.msk.bf16.vlgmr.msra.gmra.mxu3 %vm64_vm0, %v649_v33  ;;  %v648_v7 = vpack.c.bf16 %v2108_v45, %v2093_v17  ;;  %v764_v45 = vld [vmem:[%s2305_s2 + $0x40] sm:$0xff] }
 0x165   :  { %976 = vmatmul.msk.bf16.gmra.mxu0 %vm64_vm0, %v644_v47  ;;  %978 = vmatmul.msk.bf16.gmra.mxu1 %vm64_vm0, %v646_v34 }
 0x166   :  { %982 = vmatmul.msk.bf16.gmra.mxu3 %vm64_vm0, %v650_v6  ;;  %980 = vmatmul.msk.bf16.gmra.mxu2 %vm64_vm0, %v648_v7  ;;  %vm916_vm0 = vcmask 7168  }
 0x1d2   :  { %v684_v50 = vpop.f32.mrf.mxu0  ;;  %v694_v33 = vpop.f32.mrf.mxu1 }
 0x1d3   :  { %v724_v28 = vmul.f32 1.442695, %v684_v50  ;;  %v732_v61 = vmul.f32 1.442695, %v694_v33  ;;  %v766_v33 = vld [vmem:[%s2305_s2 + $0x50] sm:$0xff] }
 0x1d5   :  { %1056 = vpow2.f32 %v724_v28  ;;  %v2198_v28 = vpop.xlane.xlu1 %568 }
 0x1d6   :  { %1058 = vpow2.f32 %v732_v61 }
 0x1d9   :  { %v704_v17 = vpop.f32.mrf.mxu2  ;;  %v714_v2 = vpop.f32.mrf.mxu3 }
 0x1da   :  { %v740_v12 = vmul.f32 1.442695, %v704_v17  ;;  %v686_v59 = vpop.f32.mrf.mxu0  ;;  %v696_v25 = vpop.f32.mrf.mxu1  ;;  %v748_v60 = vmul.f32 1.442695, %v714_v2 }
 0x1db   :  { %v1057_v39 = vpop.eup %1056  ;;  %v726_v53 = vmul.f32 1.442695, %v686_v59  ;;  %v734_v4 = vmul.f32 1.442695, %v696_v25  ;;  %v767_v25 = vld [vmem:[%s2305_s2 + $0x58] sm:$0xff] }
 0x1dc   :  { %v1059_v34 = vpop.eup %1058  ;;  %1060 = vpow2.f32 %v740_v12  ;;  %v772_v52 = vmul.f32 %v1057_v39, %v756_v18  ;;  %v759_v12 = vld [vmem:[%s2305_s2 + $0x18] sm:$0xff] }
 0x1dd   :  { %v776_v8 = vmul.f32 %v1059_v34, %v760_v63  ;;  %1062 = vpow2.f32 %v726_v53  ;;  %v2203_v63 = vpop.xlane.xlu1 %574 }
 0x1de   :  { %788 = vadd.xlane.f32.xlu1 %v772_v52  ;;  %1064 = vpow2.f32 %v748_v60 }
 0x1df   :  { %796 = vadd.xlane.f32.xlu2 %v776_v8  ;;  %1066 = vpow2.f32 %v734_v4  ;;  %v763_v8 = vld [vmem:[%s2305_s2 + $0x38] sm:$0xff] }
 0x1e1   :  { %v716_v24 = vpop.f32.mrf.mxu3  ;;  %v706_v11 = vpop.f32.mrf.mxu2 }
 0x1e2   :  { %v1061_v40 = vpop.eup %1060  ;;  %v742_v44 = vmul.f32 1.442695, %v706_v11  ;;  %v750_v62 = vmul.f32 1.442695, %v716_v24  ;;  %v689_v54 = vpop.f32.mrf.mxu0 }
 0x1e3   :  { %v780_v56 = vmul.f32 %v1061_v40, %v764_v45  ;;  %v1063_v36 = vpop.eup %1062  ;;  %v728_v57 = vmul.f32 1.442695, %v689_v54  ;;  %v699_v16 = vpop.f32.mrf.mxu1 }
 0x1e4   :  { %v773_v58 = vmul.f32 %v1063_v36, %v757_v35  ;;  %v1065_v14 = vpop.eup %1064  ;;  %v736_v48 = vmul.f32 1.442695, %v699_v16 }
 0x1e5   :  { %v1067_v38 = vpop.eup %1066  ;;  %v784_v43 = vmul.f32 %v1065_v14, %v768_v10  ;;  %v2208_v40 = vpop.xlane.xlu1 %580 }
 0x1e6   :  { %604 = vadd.xlane.f32.xlu1 %v603_v19  ;;  %v777_v3 = vmul.f32 %v1067_v38, %v761_v32  ;;  %v2213_v19 = vpop.xlane.xlu2 %565  ;;  %v832_v16 = vmul.f32 1.442695, %v2208_v40 }
 0x1e7   :  { %804 = vadd.xlane.f32.xlu2 %v780_v56 }
 0x1e9   :  { %v719_v23 = vpop.f32.mrf.mxu3  ;;  %v709_v46 = vpop.f32.mrf.mxu2 }
 0x1ea   :  { %v752_v29 = vmul.f32 1.442695, %v719_v23  ;;  %v744_v49 = vmul.f32 1.442695, %v709_v46  ;;  %v691_v6 = vpop.f32.mrf.mxu0 }
 0x1eb   :  { %v730_v47 = vmul.f32 1.442695, %v691_v6  ;;  %v701_v61 = vpop.f32.mrf.mxu1 }
 0x1ec   :  { %1068 = vpow2.f32 %v752_v29  ;;  %v738_v2 = vmul.f32 1.442695, %v701_v61 }
 0x1ed   :  { %1070 = vpow2.f32 %v742_v44  ;;  %v2215_v60 = vpop.xlane.xlu1 %583 }
 0x1ee   :  { %607 = vadd.xlane.f32.xlu1 %v606_v27  ;;  %1072 = vpow2.f32 %v750_v62  ;;  %v2220_v35 = vpop.xlane.xlu2 %571  ;;  %v822_v62 = vmul.f32 1.442695, %v2213_v19 }
 0x1ef   :  { %790 = vadd.xlane.f32.xlu2 %v773_v58  ;;  %1074 = vpow2.f32 %v728_v57  ;;  %v826_v46 = vmul.f32 1.442695, %v2220_v35 }
 0x1f0   :  { %1076 = vpow2.f32 %v736_v48 }
 0x1f1   :  { %1078 = vpow2.f32 %v744_v49  ;;  %v711_v39 = vpop.f32.mrf.mxu2  ;;  %v721_v53 = vpop.f32.mrf.mxu3 }
 0x1f2   :  { %v1069_v55 = vpop.eup %1068  ;;  %1080 = vpow2.f32 %v730_v47  ;;  %v746_v52 = vmul.f32 1.442695, %v711_v39  ;;  %v754_v24 = vmul.f32 1.442695, %v721_v53 }
 0x1f3   :  { %v1071_v1 = vpop.eup %1070  ;;  %v786_v51 = vmul.f32 %v1069_v55, %v770_v20  ;;  %1082 = vpow2.f32 %v738_v2 }
 0x1f4   :  { %v781_v0 = vmul.f32 %v1071_v1, %v765_v37  ;;  %v1073_v41 = vpop.eup %1072  ;;  %1084 = vpow2.f32 %v746_v52  ;;  %v820_v37 = vmul.f32 1.442695, %v2193_v9 }
 0x1f5   :  { %v785_v42 = vmul.f32 %v1073_v41, %v769_v31  ;;  %v1075_v22 = vpop.eup %1074  ;;  %1086 = vpow2.f32 %v754_v24  ;;  %v2222_v23 = vpop.xlane.xlu1 %586 }
 0x1f6   :  { %812 = vadd.xlane.f32.xlu1 %v784_v43  ;;  %v774_v21 = vmul.f32 %v1075_v22, %v758_v15  ;;  %v1077_v13 = vpop.eup %1076  ;;  %v2224_v11 = vpop.xlane.xlu2 %577  ;;  %1088 = vpow2.f32 %v822_v62 }
 0x1f7   :  { %798 = vadd.xlane.f32.xlu2 %v777_v3  ;;  %v778_v7 = vmul.f32 %v1077_v13, %v762_v5  ;;  %v1079_v50 = vpop.eup %1078  ;;  %1090 = vpow2.f32 %v820_v37  ;;  %v830_v41 = vmul.f32 1.442695, %v2224_v11  ;;  %v836_v13 = vmul.f32 1.442695, %v2222_v23 }
 0x1f8   :  { %v782_v17 = vmul.f32 %v1079_v50, %v766_v33  ;;  %v1081_v18 = vpop.eup %1080 }
 0x1f9   :  { %v775_v34 = vmul.f32 %v1081_v18, %v759_v12  ;;  %v1083_v59 = vpop.eup %1082 }
 0x1fa   :  { %v779_v30 = vmul.f32 %v1083_v59, %v763_v8  ;;  %v1085_v45 = vpop.eup %1084 }
 0x1fb   :  { %v783_v56 = vmul.f32 %v1085_v45, %v767_v25  ;;  %v1087_v4 = vpop.eup %1086 }
 0x1fc   :  { %v787_v36 = vmul.f32 %v1087_v4, %v771_v26  ;;  %v1089_v31 = vpop.eup %1088 }
 0x1fd   :  { %v2226_v58 = vpop.xlane.xlu1 %589 }
 0x1fe   :  { %816 = vadd.xlane.f32.xlu1 %v786_v51  ;;  %v824_v51 = vmul.f32 1.442695, %v2198_v28  ;;  %v838_v6 = vmul.f32 1.442695, %v2226_v58 }
 0x1ff   :  { %806 = vadd.xlane.f32.xlu2 %v781_v0  ;;  %v828_v0 = vmul.f32 1.442695, %v2203_v63 }
 0x200   :  { %1092 = vpow2.f32 %v824_v51 }
 0x201   :  { %1094 = vpow2.f32 %v828_v0 }
 0x202   :  { %1096 = vpow2.f32 %v830_v41 }
 0x203   :  { %1098 = vpow2.f32 %v832_v16 }
 0x205   :  { %v2228_v29 = vpop.xlane.xlu1 %592 }
 0x206   :  { %v840_v47 = vmul.f32 1.442695, %v2228_v29 }
 0x207   :  { %814 = vadd.xlane.f32.xlu2 %v785_v42  ;;  %v1091_v42 = vpop.eup %1090 }
 0x208   :  { %v1093_v22 = vpop.eup %1092 }
 0x20d   :  { %v2232_v14 = vpop.xlane.xlu1 %595 }
 0x20f   :  { %792 = vadd.xlane.f32.xlu2 %v774_v21 }
 0x215   :  { %v2234_v32 = vpop.xlane.xlu1 %598 }
 0x216   :  { %v844_v59 = vmul.f32 1.442695, %v2234_v32 }
 0x217   :  { %800 = vadd.xlane.f32.xlu2 %v778_v7  ;;  %v1095_v7 = vpop.eup %1094 }
 0x218   :  { %v1097_v50 = vpop.eup %1096 }
 0x219   :  { %v1099_v61 = vpop.eup %1098 }
 0x21d   :  { %v2238_v3 = vpop.xlane.xlu1 %601 }
 0x21f   :  { %808 = vadd.xlane.f32.xlu2 %v782_v17  ;;  %v834_v17 = vmul.f32 1.442695, %v2215_v60 }
 0x227   :  { %794 = vadd.xlane.f32.xlu2 %v775_v34 }
 0x22f   :  { %802 = vadd.xlane.f32.xlu2 %v779_v30  ;;  %v846_v30 = vmul.f32 1.442695, %v2238_v3 }
 0x237   :  { %810 = vadd.xlane.f32.xlu2 %v783_v56 }
 0x23f   :  { %818 = vadd.xlane.f32.xlu2 %v787_v36 }
 0x251   :  { %v789_v20 = vpop.xlane.xlu1 %788 }
 0x252   :  { %v797_v27 = vpop.xlane.xlu2 %796  ;;  %v852_v15 = vsub.f32 %v789_v20, %v1091_v42 }
 0x253   :  { %v856_v33 = vsub.f32 %v797_v27, %v1095_v7 }
 0x259   :  { %v2245_v54 = vpop.xlane.xlu1 %604 }
 0x25a   :  { %v2230_v44 = vpop.xlane.xlu2 %804  ;;  %v848_v4 = vmul.f32 1.442695, %v2245_v54 }
 0x261   :  { %v2251_v49 = vpop.xlane.xlu1 %607 }
 0x262   :  { %v791_v10 = vpop.xlane.xlu2 %790 }
 0x263   :  { %v853_v48 = vsub.f32 %v791_v10, %v1089_v31 }
 0x265   :  { %1100 = vlog2.f32 %v853_v48 }
 0x266   :  { %1102 = vlog2.f32 %v852_v15 }
 0x269   :  { %v813_v45 = vpop.xlane.xlu1 %812 }
 0x26a   :  { %v799_v38 = vpop.xlane.xlu2 %798 }
 0x26b   :  { %v1101_v2 = vpop.eup %1100  ;;  %v857_v18 = vsub.f32 %v799_v38, %v1097_v50  ;;  %v842_v38 = vmul.f32 1.442695, %v2232_v14 }
 0x26c   :  { %v1103_v12 = vpop.eup %1102  ;;  %v871_v8 = vmul.f32 0.6931472, %v1101_v2 }
 0x26d   :  { %v869_v24 = vmul.f32 0.6931472, %v1103_v12 }
 0x26e   :  { %v901_v20 = vsub.f32 %v871_v8, %v2213_v19 }
 0x270   :  { %v918_v19 = vsel %vm916_vm0, %v901_v20, 0.0 }
 0x272   :  { %v2236_v43 = vpop.xlane.xlu2 %806 }
 0x27a   :  { %v2240_v55 = vpop.xlane.xlu2 %814 }
 0x282   :  { %v793_v1 = vpop.xlane.xlu2 %792 }
 0x283   :  { %v854_v21 = vsub.f32 %v793_v1, %v1093_v22  ;;  %v900_v1 = vsub.f32 %v869_v24, %v2193_v9 }
 0x285   :  { %1104 = vlog2.f32 %v854_v21  ;;  %v917_v9 = vsel %vm916_vm0, %v900_v1, 0.0 }
 0x286   :  { %1106 = vpow2.f32 %v826_v46  ;;  %v919_v46 = vadd.f32 %v918_v19, %v917_v9 }
 0x287   :  { %1108 = vpow2.f32 %v836_v13 }
 0x288   :  { %1110 = vpow2.f32 %v838_v6 }
 0x289   :  { %1112 = vpow2.f32 %v840_v47  ;;  %v850_v47 = vmul.f32 1.442695, %v2251_v49 }
 0x28a   :  { %v801_v57 = vpop.xlane.xlu2 %800  ;;  %1114 = vlog2.f32 %v856_v33 }
 0x28b   :  { %v858_v39 = vsub.f32 %v801_v57, %v1099_v61  ;;  %v1105_v34 = vpop.eup %1104  ;;  %1116 = vpow2.f32 %v834_v17 }
 0x28c   :  { %v1107_v52 = vpop.eup %1106  ;;  %1118 = vlog2.f32 %v857_v18  ;;  %v873_v26 = vmul.f32 0.6931472, %v1105_v34 }
 0x28d   :  { %v1109_v56 = vpop.eup %1108  ;;  %1120 = vlog2.f32 %v858_v39 }
 0x28e   :  { %v1111_v36 = vpop.eup %1110  ;;  %v860_v27 = vsub.f32 %v2230_v44, %v1109_v56  ;;  %v902_v0 = vsub.f32 %v873_v26, %v2198_v28 }
 0x28f   :  { %v1113_v10 = vpop.eup %1112  ;;  %v861_v37 = vsub.f32 %v2236_v43, %v1111_v36 }
 0x290   :  { %v1115_v62 = vpop.eup %1114  ;;  %v920_v15 = vsel %vm916_vm0, %v902_v0, 0.0 }
 0x291   :  { %v1117_v51 = vpop.eup %1116  ;;  %v877_v31 = vmul.f32 0.6931472, %v1115_v62  ;;  %v921_v2 = vadd.f32 %v920_v15, %v919_v46 }
 0x292   :  { %v2254_v5 = vpop.xlane.xlu2 %808  ;;  %v1119_v57 = vpop.eup %1118 }
 0x293   :  { %v862_v44 = vsub.f32 %v2254_v5, %v1113_v10  ;;  %v1121_v41 = vpop.eup %1120  ;;  %v879_v22 = vmul.f32 0.6931472, %v1119_v57  ;;  %v817_v5 = vpop.xlane.xlu1 %816  ;;  %v904_v7 = vsub.f32 %v877_v31, %v2203_v63 }
 0x294   :  { %v881_v50 = vmul.f32 0.6931472, %v1121_v41 }
 0x295   :  { %v905_v12 = vsub.f32 %v879_v22, %v2224_v11  ;;  %v924_v63 = vsel %vm916_vm0, %v904_v7, 0.0 }
 0x297   :  { %v926_v11 = vsel %vm916_vm0, %v905_v12, 0.0 }
 0x29a   :  { %v795_v53 = vpop.xlane.xlu2 %794 }
 0x29b   :  { %v855_v25 = vsub.f32 %v795_v53, %v1107_v52 }
 0x29d   :  { %1122 = vlog2.f32 %v855_v25 }
 0x29e   :  { %1124 = vpow2.f32 %v844_v59 }
 0x29f   :  { %1126 = vpow2.f32 %v846_v30 }
 0x2a0   :  { %1128 = vpow2.f32 %v848_v4 }
 0x2a1   :  { %1130 = vlog2.f32 %v860_v27 }
 0x2a2   :  { %1132 = vpow2.f32 %v842_v38  ;;  %v803_v16 = vpop.xlane.xlu2 %802 }
 0x2a3   :  { %v1123_v42 = vpop.eup %1122  ;;  %1134 = vlog2.f32 %v861_v37  ;;  %v859_v43 = vsub.f32 %v803_v16, %v1117_v51 }
 0x2a4   :  { %v1125_v48 = vpop.eup %1124  ;;  %1136 = vlog2.f32 %v862_v44  ;;  %v875_v28 = vmul.f32 0.6931472, %v1123_v42 }
 0x2a5   :  { %v1127_v21 = vpop.eup %1126  ;;  %v864_v13 = vsub.f32 %v813_v45, %v1125_v48  ;;  %1138 = vlog2.f32 %v859_v43 }
 0x2a6   :  { %v1129_v6 = vpop.eup %1128  ;;  %v903_v33 = vsub.f32 %v875_v28, %v2220_v35  ;;  %v865_v17 = vsub.f32 %v2240_v55, %v1127_v21  ;;  %v906_v35 = vsub.f32 %v881_v50, %v2208_v40 }
 0x2a7   :  { %v1131_v61 = vpop.eup %1130  ;;  %v866_v39 = vsub.f32 %v817_v5, %v1129_v6  ;;  %1140 = vlog2.f32 %v864_v13 }
 0x2a8   :  { %v1133_v18 = vpop.eup %1132  ;;  %v922_v34 = vsel %vm916_vm0, %v903_v33, 0.0  ;;  %v885_v53 = vmul.f32 0.6931472, %v1131_v61  ;;  %1142 = vpow2.f32 %v850_v47  ;;  %v928_v36 = vsel %vm916_vm0, %v906_v35, 0.0 }
 0x2a9   :  { %v1135_v52 = vpop.eup %1134  ;;  %v923_v59 = vadd.f32 %v922_v34, %v921_v2  ;;  %1144 = vlog2.f32 %v865_v17 }
 0x2aa   :  { %v1137_v8 = vpop.eup %1136  ;;  %v811_v30 = vpop.xlane.xlu2 %810  ;;  %v887_v25 = vmul.f32 0.6931472, %v1135_v52  ;;  %1146 = vlog2.f32 %v866_v39  ;;  %v908_v26 = vsub.f32 %v885_v53, %v2222_v23 }
 0x2ab   :  { %v1139_v24 = vpop.eup %1138  ;;  %v925_v55 = vadd.f32 %v924_v63, %v923_v59  ;;  %v863_v45 = vsub.f32 %v811_v30, %v1133_v18  ;;  %v889_v27 = vmul.f32 0.6931472, %v1137_v8 }
 0x2ac   :  { %v883_v56 = vmul.f32 0.6931472, %v1139_v24  ;;  %v909_v62 = vsub.f32 %v887_v25, %v2226_v58  ;;  %v932_v44 = vsel %vm916_vm0, %v908_v26, 0.0 }
 0x2ad   :  { %v927_v4 = vadd.f32 %v926_v11, %v925_v55  ;;  %1148 = vlog2.f32 %v863_v45  ;;  %v1141_v40 = vpop.eup %1140  ;;  %v910_v23 = vsub.f32 %v889_v27, %v2228_v29 }
 0x2ae   :  { %v907_v10 = vsub.f32 %v883_v56, %v2215_v60  ;;  %v1143_v20 = vpop.eup %1142  ;;  %v893_v57 = vmul.f32 0.6931472, %v1141_v40  ;;  %v934_v60 = vsel %vm916_vm0, %v909_v62, 0.0 }
 0x2af   :  { %v929_v38 = vadd.f32 %v928_v36, %v927_v4  ;;  %v1145_v37 = vpop.eup %1144  ;;  %v936_v22 = vsel %vm916_vm0, %v910_v23, 0.0 }
 0x2b0   :  { %v930_v1 = vsel %vm916_vm0, %v907_v10, 0.0  ;;  %v1147_v0 = vpop.eup %1146  ;;  %v895_v42 = vmul.f32 0.6931472, %v1145_v37  ;;  %v912_v58 = vsub.f32 %v893_v57, %v2234_v32 }
 0x2b1   :  { %v931_v51 = vadd.f32 %v930_v1, %v929_v38  ;;  %v897_v48 = vmul.f32 0.6931472, %v1147_v0 }
 0x2b2   :  { %v819_v41 = vpop.xlane.xlu2 %818  ;;  %v913_v29 = vsub.f32 %v895_v42, %v2238_v3  ;;  %v940_v13 = vsel %vm916_vm0, %v912_v58, 0.0 }
 0x2b3   :  { %v1149_v31 = vpop.eup %1148  ;;  %v933_v19 = vadd.f32 %v932_v44, %v931_v51  ;;  %v867_v16 = vsub.f32 %v819_v41, %v1143_v20  ;;  %v914_v5 = vsub.f32 %v897_v48, %v2245_v54 }
 0x2b4   :  { %v891_v9 = vmul.f32 0.6931472, %v1149_v31  ;;  %v942_v32 = vsel %vm916_vm0, %v913_v29, 0.0 }
 0x2b5   :  { %v935_v43 = vadd.f32 %v934_v60, %v933_v19  ;;  %1150 = vlog2.f32 %v867_v16 }
 0x2b6   :  { %v911_v15 = vsub.f32 %v891_v9, %v2232_v14  ;;  %v944_v14 = vsel %vm916_vm0, %v914_v5, 0.0 }
 0x2b7   :  { %v937_v28 = vadd.f32 %v936_v22, %v935_v43 }
 0x2b8   :  { %v938_v21 = vsel %vm916_vm0, %v911_v15, 0.0 }
 0x2b9   :  { %v939_v46 = vadd.f32 %v938_v21, %v937_v28 }
 0x2bb   :  { %v1151_v6 = vpop.eup %1150  ;;  %v941_v7 = vadd.f32 %v940_v13, %v939_v46 }
 0x2bc   :  { %v899_v47 = vmul.f32 0.6931472, %v1151_v6 }
 0x2bd   :  { %v943_v50 = vadd.f32 %v942_v32, %v941_v7 }
 0x2be   :  { %v915_v33 = vsub.f32 %v899_v47, %v2251_v49 }
 0x2bf   :  { %v945_v61 = vadd.f32 %v944_v14, %v943_v50 }
 0x2c0   :  { %v946_v3 = vsel %vm916_vm0, %v915_v33, 0.0 }
 0x2c1   :  { %v947_v17 = vadd.f32 %v946_v3, %v945_v61 }
 0x2c3   :  { %948 = vadd.xlane.f32.xlu1 %v947_v17 }
 0x336   :  { %v949_v2 = vpop.xlane.xlu1 %948 }
 0x337   :  { %v950_v18 = vrot.slane %v949_v2, 4 }
 0x339   :  { %v951_v12 = vadd.f32 %v950_v18, %v949_v2 }
 0x33b   :  { %v952_v39 = vrot.slane %v951_v12, 2 }
 0x33d   :  { %v953_v54 = vadd.f32 %v952_v39, %v951_v12 }
 0x33f   :  { %v954_v34 = vrot.slane %v953_v54, 1 }
 0x341   :  { %v955_v52 = vadd.f32 %v954_v34, %v953_v54 }
 0x343   :  { %989 = vpush %v955_v52 }
 0x374   :  { %s990_s8 = spop %989 }
 0x375   :  { %s957_s9 = smul.f32 0.0078125, %s990_s8 }
 0x377   :  { %959 = sst [smem:[#allocation2]] %s957_s9 }
 0x378   :  { %968 = dma.smem_to_hbm %s1171_s10, 16, %s966_s7, [#allocation3]  }
 0x379   :  { %1169 = dma.done.wait [#allocation3], 16  }
 0x37a   :  { %1170 = vsyncadd [#allocation3], 4294967280 }
 0x37b   :  { %973 = sfence }
 0x37c   :  { %974 = vsyncpa [#allocation3], 1 }

</bundles_post_ra>
